<compile_context>
chip_gen: v6e
topology: v6e:2x2x1
jax: 0.10.0
libtpu: 0.0.40
codegen_flags: <defaults>
</compile_context>

<pallas_src>
import functools

import jax
import jax.numpy as jnp
from jax import lax
from jax.experimental import pallas as pl
from jax.experimental.pallas import tpu as pltpu


# ---------------------------------------------------------------------------
# Kernel
# ---------------------------------------------------------------------------
def _row_linear_kernel(x_ref, w_ref, *rest, x_cast_dtype, has_bias, single_k):
    """One (tm, tn) output tile.  The K reduction runs on grid axis 2.

    x_ref: (tm, tk) activation tile.
    w_ref: (tn, tk) weight tile in PyTorch (out, in) layout; contracted on K
           (transposed-B matmul straight on the MXU, no host-side transpose).
    """
    if has_bias:
        b_ref, *rest = rest
    else:
        b_ref = None
    if single_k:
        (o_ref,) = rest
        acc_ref = None
    else:
        o_ref, acc_ref = rest

    a = x_ref[...]
    if x_cast_dtype is not None:
        a = a.astype(x_cast_dtype)   # per-tile activation cast only;
    w = w_ref[...]                   # weight already streamed at compute dtype

    partial = lax.dot_general(
        a, w,
        dimension_numbers=(((1,), (1,)), ((), ())),    # x @ W.T on the MXU
        preferred_element_type=jnp.float32,
    )

    if single_k:
        # K fits in one tile: write straight to the output, no accumulator
        # scratch, no extra (tm, tn) f32 VMEM passes.
        if has_bias:
            partial = partial + b_ref[...].astype(jnp.float32)
        o_ref[...] = partial.astype(o_ref.dtype)
        return

    k = pl.program_id(2)

    @pl.when(k == 0)                 # assign (skips the zero-init VMEM pass)
    def _():
        acc_ref[...] = partial

    @pl.when(k != 0)
    def _():
        acc_ref[...] += partial

    @pl.when(k == pl.num_programs(2) - 1)
    def _():
        acc = acc_ref[...]
        if has_bias:
            acc = acc + b_ref[...].astype(jnp.float32)
        o_ref[...] = acc.astype(o_ref.dtype)


# ---------------------------------------------------------------------------
# Hardware queries (best effort; safe fallbacks)
# ---------------------------------------------------------------------------
def _round_up(x, m):
    return ((x + m - 1) // m) * m


def _vmem_budget_bytes():
    """Chip-aware scoped-VMEM budget (v7x only has 64 MiB physical VMEM)."""
    try:
        info = pltpu.get_tpu_info()
        cap = int(getattr(info, "vmem_capacity_bytes", 0) or 0)
        if cap > 0:
            return min(cap // 2, 48 << 20)
    except Exception:
        pass
    return 32 << 20


def _device_kind():
    try:
        return jax.devices()[0].device_kind.lower()
    except Exception:
        return ""


def _num_tensorcores():
    """TensorCores per chip: 2 on v7x, 1 on v5e/v6e.  Best effort."""
    try:
        info = pltpu.get_tpu_info()
        for attr in ("num_cores", "tensorcore_count", "num_tensorcores",
                     "cores_per_chip"):
            v = getattr(info, attr, None)
            if v:
                return int(v)
    except Exception:
        pass
    return 2 if "v7" in _device_kind() else 1


def _is_v5e():
    kind = _device_kind()
    return ("v5e" in kind) or ("v5 lite" in kind) or ("v5lite" in kind)


def _auto_compute_dtype(x_dtype, w_dtype):
    """v5e has no native f32 MXU path: for all-f32 inputs default to bf16
    operands with f32 accumulation there.  Opt out: compute_dtype=jnp.float32."""
    if (_is_v5e() and jnp.dtype(x_dtype) == jnp.dtype(jnp.float32)
            and jnp.dtype(w_dtype) == jnp.dtype(jnp.float32)):
        return jnp.bfloat16
    return None


# ---------------------------------------------------------------------------
# Tile selection
# ---------------------------------------------------------------------------
def _tile_vmem_bytes(tm, tn, tk, x_bytes, w_bytes, out_bytes):
    # double-buffered x / w / out streams + one f32 accumulator tile.
    return (2 * tm * tk * x_bytes + 2 * tn * tk * w_bytes
            + 2 * tm * tn * out_bytes + tm * tn * 4)


_TILE_CAP_CANDIDATES = (
    (1024, 2048, 512),
    (512, 2048, 512),
    (512, 1024, 512),
    (512, 1024, 256),
    (256, 1024, 256),
    (256, 512, 256),
    (256, 512, 128),
    (128, 256, 128),
    (128, 128, 128),
)


def _tile_caps(x_bytes, w_bytes, out_bytes, vmem_budget):
    """Dtype/VMEM-aware output-tile caps.  Arithmetic intensity is
    ~2 / (x_bytes/tn + w_bytes/tm) flop per HBM byte, so bigger (tm, tn)
    directly cuts weight re-reads (x M/tm) and activation re-reads (x N/tn).
    bf16 operands on 128-MiB-VMEM chips (v5e/v6e) get (1024, 2048); f32 or
    v7x's 64-MiB VMEM fall back to (512, 1024/2048)."""
    limit = int(vmem_budget * 0.65)     # headroom for bias + internal scratch
    for caps in _TILE_CAP_CANDIDATES:
        if _tile_vmem_bytes(*caps, x_bytes, w_bytes, out_bytes) <= limit:
            return caps
    return _TILE_CAP_CANDIDATES[-1]


def _pick_tile(dim, cap, align, min_tile=None):
    """Largest aligned tile <= cap.  Prefers exact divisors of `dim` (so the
    weight/activations are consumed in place with no jnp.pad copy); otherwise
    minimizes padding, breaking ties toward the larger tile."""
    if dim <= cap:
        return dim                                     # full-extent block
    cap = max(align, cap // align * align)
    floor = align if min_tile is None else max(align, min_tile // align * align)
    best_t, best_pad = cap, _round_up(dim, cap)
    t = cap
    while t >= floor:
        padded = _round_up(dim, t)
        if padded == dim:
            return t                                   # largest exact divisor
        if padded < best_pad:
            best_t, best_pad = t, padded
        t -= align
    return best_t


def _choose_tiles(M, N, K, *, x_bytes, w_bytes, out_bytes, vmem_budget,
                  num_cores):
    cap_m, cap_n, cap_k = _tile_caps(x_bytes, w_bytes, out_bytes, vmem_budget)
    # sublane packing for the second-minor (M) axis: 8 f32 / 16 bf16 / 32 int8
    align_m = max(8, 32 // max(1, min(x_bytes, out_bytes)))
    tm = _pick_tile(M, cap_m, align_m, min_tile=cap_m // 2)
    tn = _pick_tile(N, cap_n, 128, min_tile=cap_n // 2)
    tk = _pick_tile(K, cap_k, 128, min_tile=128)   # tk doesn't affect reuse;
                                                   # small exact divisors beat pads
    # Megacore split: only on chips with 2 TensorCores (v7x).  If the (i, j)
    # grid collapsed to one point, split the N axis so each core streams half
    # the *weight* (splitting M would duplicate the whole weight stream).
    if (num_cores >= 2
            and _round_up(M, tm) == tm and _round_up(N, tn) == tn
            and N >= 256 and N % 256 == 0):
        tn = N // 2
    return tm, tn, tk


# ---------------------------------------------------------------------------
# Wrapper
# ---------------------------------------------------------------------------
def row_parallel_linear_no_comm(input_, weight, bias=None, *,
                                skip_bias_add=False, compute_dtype="auto"):
    """JAX/Pallas equivalent of RowParallelLinearNoComm.forward.

    input_: (..., input_size)
    weight: (output_size, input_size) -- PyTorch layout, contracted on K by
            the kernel (no transpose materialized).
    bias:   (output_size,) or None
    compute_dtype: MXU operand dtype.  "auto" (default) keeps the input dtype
        except on v5e, where all-f32 inputs use bf16 operands with f32
        accumulation (opt out with compute_dtype=jnp.float32).  Callers that
        re-use an f32 weight across many calls with bf16 compute should
        pre-cast the weight once and pass it in bf16.
    Returns (output, output_bias) exactly like the PyTorch module.
    """
    orig_shape = input_.shape
    K = orig_shape[-1]
    N, Kw = weight.shape
    assert Kw == K, "weight must be (output_size, input_size)"

    out_dtype = input_.dtype
    add_bias = (bias is not None) and (not skip_bias_add)

    # ---- operand dtype handling -------------------------------------------
    if isinstance(compute_dtype, str) and compute_dtype == "auto":
        compute_dtype = _auto_compute_dtype(input_.dtype, weight.dtype)
    if compute_dtype is None and input_.dtype != weight.dtype:
        compute_dtype = jnp.promote_types(input_.dtype, weight.dtype)
    if compute_dtype is not None:
        cd = jnp.dtype(compute_dtype)
        if cd == jnp.dtype(input_.dtype) and cd == jnp.dtype(weight.dtype):
            compute_dtype = None                        # no casts needed

    w = weight
    if compute_dtype is not None and w.dtype != jnp.dtype(compute_dtype):
        # Stream the weight at the compute dtype (halves weight HBM traffic
        # for f32 params with bf16 compute).  Activation casts stay per-tile
        # inside the kernel.
        w = w.astype(compute_dtype)
    x_cast_dtype = None
    if compute_dtype is not None and input_.dtype != jnp.dtype(compute_dtype):
        x_cast_dtype = jnp.dtype(compute_dtype)

    x2d = input_.reshape(-1, K)
    M = x2d.shape[0]

    x_bytes = jnp.dtype(x2d.dtype).itemsize
    w_bytes = jnp.dtype(w.dtype).itemsize
    out_bytes = jnp.dtype(out_dtype).itemsize
    vmem_budget = _vmem_budget_bytes()

    tm, tn, tk = _choose_tiles(
        M, N, K, x_bytes=x_bytes, w_bytes=w_bytes, out_bytes=out_bytes,
        vmem_budget=vmem_budget, num_cores=_num_tensorcores())

    M_pad = _round_up(M, tm)
    N_pad = _round_up(N, tn)
    K_pad = _round_up(K, tk)

    if (M_pad, K_pad) != (M, K):
        x2d = jnp.pad(x2d, ((0, M_pad - M), (0, K_pad - K)))
    if (N_pad, K_pad) != (N, K):
        # Rare: _pick_tile prefers exact divisors on N/K, so the weight is
        # normally consumed in place with no full-array pad copy.
        w = jnp.pad(w, ((0, N_pad - N), (0, K_pad - K)))

    grid = (M_pad // tm, N_pad // tn, K_pad // tk)
    single_k = grid[2] == 1

    in_specs = [
        pl.BlockSpec((tm, tk), lambda i, j, k: (i, k)),   # x (M, K)
        pl.BlockSpec((tn, tk), lambda i, j, k: (j, k)),   # W (N, K), as-is
    ]
    operands = [x2d, w]
    if add_bias:
        b_row = bias.reshape(1, N)
        if N_pad != N:
            b_row = jnp.pad(b_row, ((0, 0), (0, N_pad - N)))
        in_specs.append(pl.BlockSpec((1, tn), lambda i, j, k: (0, j)))
        operands.append(b_row)

    kernel = functools.partial(
        _row_linear_kernel, x_cast_dtype=x_cast_dtype, has_bias=add_bias,
        single_k=single_k)

    # Single-K tiles write straight to the output: no f32 accumulator at all.
    scratch_shapes = [] if single_k else [pltpu.VMEM((tm, tn), jnp.float32)]

    # HBM traffic includes the grid re-read factors (x re-read per j block,
    # W re-read per i block) so XLA schedules neighboring ops realistically.
    cost = pl.CostEstimate(
        flops=2 * M_pad * N_pad * K_pad,
        transcendentals=0,
        bytes_accessed=(M_pad * K_pad * x_bytes * grid[1]
                        + N_pad * K_pad * w_bytes * grid[0]
                        + M_pad * N_pad * out_bytes
                        + (N_pad * jnp.dtype(bias.dtype).itemsize
                           if add_bias else 0)),
    )

    out2d = pl.pallas_call(
        kernel,
        out_shape=jax.ShapeDtypeStruct((M_pad, N_pad), out_dtype),
        grid_spec=pltpu.PrefetchScalarGridSpec(
            num_scalar_prefetch=0,
            grid=grid,
            in_specs=in_specs,
            out_specs=pl.BlockSpec((tm, tn), lambda i, j, k: (i, j)),
            scratch_shapes=scratch_shapes,
        ),
        compiler_params=pltpu.CompilerParams(
            dimension_semantics=("parallel", "parallel", "arbitrary"),
            vmem_limit_bytes=vmem_budget,
        ),
        cost_estimate=cost,
    )(*operands)

    if (M_pad, N_pad) != (M, N):
        out2d = out2d[:M, :N]
    output = out2d.reshape(*orig_shape[:-1], N)

    output_bias = bias if skip_bias_add else None
    return output, output_bias


# ---------------------------------------------------------------------------
# Self-test
# ---------------------------------------------------------------------------
def _reference(x, w, b, cd):
    """F.linear reference with the same operand cast the kernel applies,
    accumulated in f32 at HIGHEST matmul precision."""
    xr, wr = x, w
    if cd is not None:
        xr = xr.astype(cd)
        wr = wr.astype(cd)
    out = jnp.matmul(xr.astype(jnp.float32), wr.astype(jnp.float32).T,
                     precision=lax.Precision.HIGHEST)
    if b is not None:
        out = out + b.astype(jnp.float32)
    return out


if __name__ == "__main__":
    batch, seq, input_size, output_size = 2, 8, 32, 32
    key = jax.random.PRNGKey(0)
    kx, kw, kx2, kx3 = jax.random.split(key, 4)

    x = jax.random.normal(kx, (batch, seq, input_size), dtype=jnp.float32)
    weight = (jax.random.normal(kw, (output_size, input_size),
                                dtype=jnp.float32) * 0.02)
    bias = jnp.zeros((output_size,), dtype=jnp.float32)

    # Effective MXU operand dtype picked by the "auto" policy (bf16 on v5e).
    cd_auto = _auto_compute_dtype(x.dtype, weight.dtype)

    def _check(out, ref, atol=2e-3, rtol=2e-3):
        diff = float(jnp.max(jnp.abs(out.astype(jnp.float32) - ref)))
        assert jnp.allclose(out.astype(jnp.float32), ref,
                            atol=atol, rtol=rtol), diff

    # Case 1: bias added in-kernel; output_bias is None.
    out, out_bias = row_parallel_linear_no_comm(x, weight, bias,
                                                skip_bias_add=False)
    out = jax.block_until_ready(out)
    assert out.shape == (batch, seq, output_size)
    assert out_bias is None
    _check(out, _reference(x, weight, bias, cd_auto))

    # Case 2: skip_bias_add -> bias returned, NOT added (bias-free kernel).
    out2, out_bias2 = row_parallel_linear_no_comm(x, weight, bias,
                                                  skip_bias_add=True)
    out2 = jax.block_until_ready(out2)
    assert out_bias2 is not None and out_bias2.shape == (output_size,)
    _check(out2, _reference(x, weight, None, cd_auto))

    # Case 3: ragged leading dims (M = 21) and no bias parameter.
    x3 = jax.random.normal(kx2, (3, 7, input_size), dtype=jnp.float32)
    out3, out_bias3 = row_parallel_linear_no_comm(x3, weight, None,
                                                  skip_bias_add=False)
    out3 = jax.block_until_ready(out3)
    assert out3.shape == (3, 7, output_size)
    assert out_bias3 is None
    _check(out3, _reference(x3, weight, None, cd_auto))

    # Case 4: bf16 params/activations, explicit bf16 MXU operands, f32 acc.
    x_bf = x.astype(jnp.bfloat16)
    w_bf = weight.astype(jnp.bfloat16)
    b_bf = bias.astype(jnp.bfloat16)
    out4, _ = row_parallel_linear_no_comm(x_bf, w_bf, b_bf,
                                          skip_bias_add=False,
                                          compute_dtype=jnp.bfloat16)
    out4 = jax.block_until_ready(out4)
    assert out4.dtype == jnp.bfloat16
    _check(out4, _reference(x_bf, w_bf, b_bf, jnp.bfloat16),
           atol=5e-3, rtol=2e-2)

    # Case 5: K larger than the tk cap -> multi-step K reduction
    # (assign-then-accumulate f32 VMEM accumulator path).
    Kbig, Nbig, Mbig = 1024, 128, 8
    x5 = jax.random.normal(kx3, (Mbig, Kbig), dtype=jnp.float32)
    w5 = (jax.random.normal(kw, (Nbig, Kbig), dtype=jnp.float32) * 0.02)
    out5, _ = row_parallel_linear_no_comm(x5, w5, None, skip_bias_add=False)
    out5 = jax.block_until_ready(out5)
    cd5 = _auto_compute_dtype(x5.dtype, w5.dtype)
    _check(out5, _reference(x5, w5, None, cd5), atol=5e-3, rtol=5e-3)

    print("KERNEL_OK")
</pallas_src>

<mosaic_0001>
module attributes {stable_mosaic.version = 11 : i64} {
  func.func @_row_linear_kernel(%arg0: i32, %arg1: i32, %arg2: i32, %arg3: memref<16x32xf32, #tpu.memory_space<vmem>>, %arg4: memref<32x32xf32, #tpu.memory_space<vmem>>, %arg5: memref<1x32xf32, #tpu.memory_space<vmem>>, %arg6: memref<16x32xf32, #tpu.memory_space<vmem>>) attributes {dimension_semantics = [#tpu.dimension_semantics<parallel>, #tpu.dimension_semantics<parallel>, #tpu.dimension_semantics<arbitrary>], iteration_bounds = array<i64: 1, 1, 1>, scalar_prefetch = 0 : i64, scratch_operands = 0 : i64, tpu.core_type = #tpu.core_type<tc>, window_params = [{transform_indices = @transform_0, window_bounds = array<i64: 16, 32>}, {transform_indices = @transform_1, window_bounds = array<i64: 32, 32>}, {transform_indices = @transform_2, window_bounds = array<i64: 1, 32>}, {transform_indices = @transform_3, window_bounds = array<i64: 16, 32>}]} {
    %c0 = arith.constant 0 : index
    %c0_0 = arith.constant 0 : index
    %0 = vector.load %arg3[%c0, %c0_0] : memref<16x32xf32, #tpu.memory_space<vmem>>, vector<16x32xf32>
    %c0_1 = arith.constant 0 : index
    %c0_2 = arith.constant 0 : index
    %1 = vector.load %arg4[%c0_1, %c0_2] : memref<32x32xf32, #tpu.memory_space<vmem>>, vector<32x32xf32>
    %cst = arith.constant dense<0.000000e+00> : vector<16x32xf32>
    %2 = tpu.matmul %0, %1, %cst {dimension_numbers = #tpu.dot_dimension_numbers<[1], [1], [0], [0], [0, 0, 1, 0], [], []>} : vector<16x32xf32>, vector<32x32xf32>, vector<16x32xf32> -> vector<16x32xf32>
    %c0_3 = arith.constant 0 : index
    %c0_4 = arith.constant 0 : index
    %3 = vector.load %arg5[%c0_3, %c0_4] : memref<1x32xf32, #tpu.memory_space<vmem>>, vector<1x32xf32>
    %4 = vector.broadcast %3 : vector<1x32xf32> to vector<16x32xf32>
    %5 = arith.addf %2, %4 : vector<16x32xf32>
    %c0_5 = arith.constant 0 : index
    %c0_6 = arith.constant 0 : index
    %6 = vector.load %arg6[%c0_5, %c0_6] : memref<16x32xf32, #tpu.memory_space<vmem>>, vector<16x32xf32>
    tpu.vector_store %arg6[%c0_5, %c0_6], %5 {strides = array<i32>} : memref<16x32xf32, #tpu.memory_space<vmem>>, vector<16x32xf32>,
    return
  }
  func.func @transform_0(%arg0: i32, %arg1: i32, %arg2: i32) -> (i32, i32) {
    %c0_i32 = arith.constant 0 : i32
    return %arg0, %arg2 : i32, i32
  }
  func.func @transform_1(%arg0: i32, %arg1: i32, %arg2: i32) -> (i32, i32) {
    %c0_i32 = arith.constant 0 : i32
    return %arg1, %arg2 : i32, i32
  }
  func.func @transform_2(%arg0: i32, %arg1: i32, %arg2: i32) -> (i32, i32) {
    %c0_i32 = arith.constant 0 : i32
    %c0_i32_0 = arith.constant 0 : i32
    return %c0_i32, %arg1 : i32, i32
  }
  func.func @transform_3(%arg0: i32, %arg1: i32, %arg2: i32) -> (i32, i32) {
    %c0_i32 = arith.constant 0 : i32
    return %arg0, %arg1 : i32, i32
  }
}

</mosaic_0001>

<bundles_post_ra>
// kernel: tpu_custom_call.1
= control target key start
LH: loop header
LB: loop body
LE: loop exit
PB: predicated region body
PF: predicated region fallthrough
CT: control target
= control target key end

     0   :  { %8 = vsyncpa [#allocation3], 0  ;;  %s323_s0 = inlined_call_operand.hbm [shape: f32[16,32], index: 0, kind: input, shape index: {}]   ;;  %s324_s1 = inlined_call_operand.hbm [shape: f32[32,32], index: 1, kind: input, shape index: {}]   ;;  %s325_s2 = inlined_call_operand.vmem [shape: f32[1,32], index: 2, kind: input, shape index: {}]   ;;  %s326_s3 = inlined_call_operand.hbm [shape: f32[16,32], index: 3, kind: output, shape index: {}]  }
   0x1   :  { %9 = vsyncpa [#allocation6], 0 }
   0x2   :  { %10 = vsyncpa [#allocation4], 0  ;;  %s265_s12 = smov [#allocation2]  }
   0x3   :  { %s16_s13 = sshll.u32 %s265_s12, 4  ;;  %s17_s13 = int_to_ptr.vmem [resolvable:$true] %s16_s13 }
   0x4   :  { %s207_s14 = scalar_lea.vmem %s17_s13, 256  ;;  %p212_p1 = scmp.lt.s32.totalorder %s17_s13, %s17_s13 }
   0x5   :  { %p208_p0 = scmp.ne.s32.totalorder %s17_s13, %s207_s14  ;;  %p213_p2 = scmp.lt.s32.totalorder %s207_s14, %s207_s14 }
   0x7   :  { %p214_p3 = por %p213_p2, %p212_p1 }
   0x9   :  { %p215_p4 = pnand %p214_p3, %p208_p0 }
   0xb   :  { %218 = shalt.err (!%p215_p4)
}
   0xc   :  { %s266_s15 = smov 128   ;;  %s267_s16 = smov 8  }
   0xd   :  { %22 = dma.hbm_to_vmem [thread:$0]  %s323_s0, 256, %s17_s13, [#allocation3], %s266_s15, %s266_s15, %s267_s16  }
   0xe   :  { %s268_s19 = smov [#allocation5]  }
   0xf   :  { %s28_s20 = sshll.u32 %s268_s19, 4  ;;  %s29_s20 = int_to_ptr.vmem [resolvable:$true] %s28_s20 }
  0x10   :  { %s227_s21 = scalar_lea.vmem %s29_s20, 512  ;;  %p232_p6 = scmp.lt.s32.totalorder %s29_s20, %s29_s20 }
  0x11   :  { %p228_p5 = scmp.ne.s32.totalorder %s29_s20, %s227_s21  ;;  %p233_p7 = scmp.lt.s32.totalorder %s227_s21, %s227_s21 }
  0x13   :  { %p234_p8 = por %p233_p7, %p232_p6 }
  0x15   :  { %p235_p9 = pnand %p234_p8, %p228_p5 }
  0x17   :  { %238 = shalt.err (!%p235_p9)
}
  0x18   :  { %34 = dma.hbm_to_vmem [thread:$0]  %s324_s1, 512, %s29_s20, [#allocation6], %s266_s15, %s266_s15, %s267_s16  }
  0x19   :  { %259 = dma.done.wait [#allocation3], 256  }
  0x1a   :  { %260 = vsyncadd [#allocation3], 4294967040 }
  0x1b   :  { %261 = dma.done.wait [#allocation6], 512  }
  0x1c   :  { %262 = vsyncadd [#allocation6], 4294966784  ;;  %vm56_vm0 = vcmask 261120   ;;  %v48_v0 = vld [vmem:[#allocation5 + $0x18] sm:$0xff]  ;;  %v47_v1 = vld [vmem:[#allocation5 + $0x10] sm:$0xff]  ;;  %s269_s24 = smov [#allocation7]  }
  0x1d   :  { %183 = vmatprep.subr.msk.mxu0 %vm56_vm0, %v48_v0  ;;  %v43_v2 = vld [vmem:[#allocation2] sm:$0xff]  ;;  %v46_v3 = vld [vmem:[#allocation5 + $0x8] sm:$0xff]  ;;  %v45_v4 = vld [vmem:[#allocation5] sm:$0xff]  ;;  %s157_s25 = sshll.u32 %s269_s24, 4  ;;  %s158_s25 = int_to_ptr.vmem [resolvable:$true] %s157_s25 }
  0x1e   :  { %184 = vmatpush3.xpose.msk.msra.mxu0 %vm56_vm0, %v48_v0  ;;  %191 = vmatprep.mubr.msk.f32.mxu0 %vm56_vm0, %v43_v2  ;;  %v44_v5 = vld [vmem:[#allocation2 + $0x8] sm:$0xff]  ;;  %v170_v6 = vld [vmem:[%s325_s2] ss:$0 sm:$0xff]  ;;  %s239_s26 = scalar_lea.vmem %s158_s25, 256  ;;  %p244_p11 = scmp.lt.s32.totalorder %s158_s25, %s158_s25 }
  0x1f   :  { %185 = vmatprep.subr.msk.mxu0 %vm56_vm0, %v47_v1  ;;  %p240_p10 = scmp.ne.s32.totalorder %s158_s25, %s239_s26  ;;  %p245_p12 = scmp.lt.s32.totalorder %s239_s26, %s239_s26 }
  0x21   :  { %p246_p13 = por %p245_p12, %p244_p11 }
  0x22   :  { %186 = vmatpush3.xpose.msk.msra.mxu0 %vm56_vm0, %v47_v1 }
  0x23   :  { %187 = vmatprep.subr.msk.mxu0 %vm56_vm0, %v46_v3  ;;  %p247_p0 = pnand %p246_p13, %p240_p10 }
  0x26   :  { %188 = vmatpush3.xpose.msk.msra.mxu0 %vm56_vm0, %v46_v3 }
  0x27   :  { %189 = vmatprep.subr.msk.mxu0 %vm56_vm0, %v45_v4 }
  0x2a   :  { %190 = vmatpush3.xpose.msk.msra.mxu0 %vm56_vm0, %v45_v4 }
  0x2d   :  { %192 = vmatmul.mubr.msk.f32.vlgmr.msra.gmra.mxu0 %vm56_vm0, %v44_v5 }
  0xed   :  { %v193_v7 = vpop.f32.mrf.mxu0 }
  0xee   :  { %v147_v8 = vadd.f32 %v193_v7, %v170_v6 }
  0xef   :  { %v141_v9 = vpop.f32.mrf.mxu0 }
  0xf0   :  { %151 = vst.msk [vmem:[#allocation7 + $0x8] sm:$0xff] %vm56_vm0, %v147_v8  ;;  %v142_v10 = vadd.f32 %v170_v6, %v141_v9 }
  0xf2   :  { %150 = vst.msk [vmem:[#allocation7] sm:$0xff] %vm56_vm0, %v142_v10 }
  0xf3   :  { %250 = shalt.err (!%p247_p0)
}
  0xf4   :  { %163 = dma.vmem_to_hbm [thread:$0]  %s158_s25, 256, %s326_s3, [#allocation4], %s266_s15, %s266_s15, %s267_s16  }
  0xf5   :  { %263 = dma.done.wait [#allocation4], 256  }
  0xf6   :  { %264 = vsyncadd [#allocation4], 4294967040 }
  0xf7   :  { %167 = vsyncpa [#allocation3], 1 }
  0xf8   :  { %168 = vsyncpa [#allocation6], 1 }
  0xf9   :  { %169 = vsyncpa [#allocation4], 1 }

</bundles_post_ra>
